<compile_context>
chip_gen: v5e
topology: v5e:2x2
jax: 0.10.0
libtpu: 0.0.40
codegen_flags: <defaults>
</compile_context>

<pallas_src>
import functools

import jax
import jax.numpy as jnp
from jax.experimental import pallas as pl
from jax.experimental.pallas import tpu as pltpu


NPAD = 128              # pad the output/feature dim to a full lane width
TM_MAX = 2048           # max batch-tile rows (fits default scoped VMEM on v5e/v6e/v7x)
SMALL_BATCH_MAX = 256   # at/below this, a single un-gridded VMEM block is fastest


def linear_kernel(x_ref, w_ref, b_ref, o_ref):
    # x_ref: (TM_or_B, 512), w_ref: (512, 128), b_ref: (1, 128), o_ref: (TM_or_B, 128)
    acc = jnp.dot(x_ref[...], w_ref[...], preferred_element_type=jnp.float32)
    o_ref[...] = (acc + b_ref[...]).astype(o_ref.dtype)


def prepare_linear_params(w, b, n_pad=NPAD):
    """One-time prep: torch-style w (out, in), b (out,) ->
    lane-padded, pre-transposed (in, n_pad) weight and (1, n_pad) bias."""
    out_f, in_f = w.shape
    w_t = jnp.zeros((in_f, n_pad), dtype=w.dtype).at[:, :out_f].set(w.T)
    b_p = jnp.zeros((1, n_pad), dtype=b.dtype).at[:, :out_f].set(b)
    return w_t, b_p


def _round_up(n, m):
    return ((n + m - 1) // m) * m


def _choose_tm(batch):
    # >= 2 tiles so the "parallel" batch axis can shard across both v7x TCs,
    # tiles a multiple of 256 rows (sublane-8 aligned, per-step DMA >> the
    # ~0.35 us fixed per-step overhead), capped at TM_MAX.  On v7x one could
    # raise TM_MAX to 4096 together with vmem_limit_bytes (~24-32 MiB).
    half = -(-batch // 2)  # ceil(batch / 2)
    return min(TM_MAX, max(256, _round_up(half, 256)))


def linear_forward(x, w_pad, b_pad, out_features, *, trim=True):
    """x: (B, in); w_pad: (in, NPAD) pre-transposed/padded; b_pad: (1, NPAD)."""
    B, K = x.shape
    Kw, n_pad = w_pad.shape
    assert K == Kw

    if B <= SMALL_BATCH_MAX:
        # Single block, no grid: operands VMEM-resident, one MXU matmul,
        # no pipeline prologue/epilogue.
        y_pad = pl.pallas_call(
            linear_kernel,
            out_shape=jax.ShapeDtypeStruct((B, n_pad), x.dtype),
            in_specs=[
                pl.BlockSpec(memory_space=pltpu.MemorySpace.VMEM),
                pl.BlockSpec(memory_space=pltpu.MemorySpace.VMEM),
                pl.BlockSpec(memory_space=pltpu.MemorySpace.VMEM),
            ],
            out_specs=pl.BlockSpec(memory_space=pltpu.MemorySpace.VMEM),
        )(x, w_pad, b_pad)
    else:
        # Batch-tiled pipelined path: stream x in (tm, K) tiles, keep
        # weight/bias VMEM-resident (constant index_map) across the grid.
        # The ragged final block is pad-read / mask-written by BlockSpec;
        # no host-side jnp.pad or output trim copies.
        tm = _choose_tm(B)
        y_pad = pl.pallas_call(
            linear_kernel,
            out_shape=jax.ShapeDtypeStruct((B, n_pad), x.dtype),
            grid=(pl.cdiv(B, tm),),
            in_specs=[
                pl.BlockSpec((tm, K), lambda i: (i, 0)),
                pl.BlockSpec((K, n_pad), lambda i: (0, 0)),
                pl.BlockSpec((1, n_pad), lambda i: (0, 0)),
            ],
            out_specs=pl.BlockSpec((tm, n_pad), lambda i: (i, 0)),
            compiler_params=pltpu.CompilerParams(
                dimension_semantics=("parallel",)
            ),
        )(x, w_pad, b_pad)

    if not trim:
        # Lane-padded (B, 128) output; cols out_features..127 are exact zeros.
        return y_pad
    return y_pad[:, :out_features]


if __name__ == "__main__":
    key = jax.random.PRNGKey(0)
    kx1, kx2, kw, kb = jax.random.split(key, 4)

    IN, OUT = 512, 10

    # Deterministic init mimicking nn.Linear default (uniform in +/- 1/sqrt(in)).
    bound = 1.0 / jnp.sqrt(jnp.float32(IN))
    w = jax.random.uniform(kw, (OUT, IN), dtype=jnp.float32, minval=-bound, maxval=bound)
    b = jax.random.uniform(kb, (OUT,), dtype=jnp.float32, minval=-bound, maxval=bound)

    # One-time parameter preparation (transpose + lane padding) -- not per call.
    w_pad, b_pad = prepare_linear_params(w, b)

    fwd = jax.jit(functools.partial(
        linear_forward, w_pad=w_pad, b_pad=b_pad, out_features=OUT))

    # 1) Small batch -> single un-gridded VMEM block.
    B1 = 8
    x1 = jax.random.normal(kx1, (B1, IN), dtype=jnp.float32)
    y1 = fwd(x1)
    jax.block_until_ready(y1)
    assert y1.shape == (B1, OUT)
    assert jnp.allclose(y1, x1 @ w.T + b, atol=1e-4, rtol=1e-4)

    # 2) Ragged larger batch -> batch-tiled grid path (partial last block
    #    handled by BlockSpec masking, no host-side pad/trim copies).
    B2 = 300
    x2 = jax.random.normal(kx2, (B2, IN), dtype=jnp.float32)
    y2 = fwd(x2)
    jax.block_until_ready(y2)
    assert y2.shape == (B2, OUT)
    assert jnp.allclose(y2, x2 @ w.T + b, atol=1e-4, rtol=1e-4)

    print("KERNEL_OK")
</pallas_src>

<mosaic_0001>
module attributes {stable_mosaic.version = 11 : i64} {
  func.func @linear_kernel(%arg0: memref<8x512xf32, #tpu.memory_space<vmem>>, %arg1: memref<512x128xf32, #tpu.memory_space<vmem>>, %arg2: memref<1x128xf32, #tpu.memory_space<vmem>>, %arg3: memref<8x128xf32, #tpu.memory_space<vmem>>) attributes {dimension_semantics = [], scalar_prefetch = 0 : i64, scratch_operands = 0 : i64, tpu.core_type = #tpu.core_type<tc>} {
    %c0 = arith.constant 0 : index
    %c0_0 = arith.constant 0 : index
    %0 = vector.load %arg0[%c0, %c0_0] : memref<8x512xf32, #tpu.memory_space<vmem>>, vector<8x512xf32>
    %c0_1 = arith.constant 0 : index
    %c0_2 = arith.constant 0 : index
    %1 = vector.load %arg1[%c0_1, %c0_2] : memref<512x128xf32, #tpu.memory_space<vmem>>, vector<512x128xf32>
    %cst = arith.constant dense<0.000000e+00> : vector<8x128xf32>
    %2 = tpu.matmul %0, %1, %cst {dimension_numbers = #tpu.dot_dimension_numbers<[1], [0], [0], [1], [0, 0, 1, 1], [], []>} : vector<8x512xf32>, vector<512x128xf32>, vector<8x128xf32> -> vector<8x128xf32>
    %c0_3 = arith.constant 0 : index
    %c0_4 = arith.constant 0 : index
    %3 = vector.load %arg2[%c0_3, %c0_4] : memref<1x128xf32, #tpu.memory_space<vmem>>, vector<1x128xf32>
    %4 = vector.broadcast %3 : vector<1x128xf32> to vector<8x128xf32>
    %5 = arith.addf %2, %4 : vector<8x128xf32>
    %c0_5 = arith.constant 0 : index
    %c0_6 = arith.constant 0 : index
    %6 = vector.load %arg3[%c0_5, %c0_6] : memref<8x128xf32, #tpu.memory_space<vmem>>, vector<8x128xf32>
    tpu.vector_store %arg3[%c0_5, %c0_6], %5 {strides = array<i32>} : memref<8x128xf32, #tpu.memory_space<vmem>>, vector<8x128xf32>,
    return
  }
}

</mosaic_0001>

<bundles_post_ra>
// kernel: linear_forward.1
= control target key start
LH: loop header
LB: loop body
LE: loop exit
PB: predicated region body
PF: predicated region fallthrough
CT: control target
= control target key end

     0   :  { %8 = vsyncpa [#allocation3], 0  ;;  %s337_s0 = inlined_call_operand.hbm [shape: f32[8,512], index: 0, kind: input, shape index: {}]   ;;  %s338_s1 = inlined_call_operand.hbm [shape: f32[512,128], index: 1, kind: input, shape index: {}]   ;;  %s339_s2 = inlined_call_operand.vmem [shape: f32[1,128], index: 2, kind: input, shape index: {}]   ;;  %s340_s3 = inlined_call_operand.hbm [shape: f32[8,128], index: 3, kind: output, shape index: {}]  }
   0x1   :  { %9 = vsyncpa [#allocation6], 0 }
   0x2   :  { %10 = vsyncpa [#allocation4], 0  ;;  %s16_s14 = sshll.u32 %s337_s0, 4  ;;  %s300_s15 = smov [#allocation2]   ;;  %s17_s14 = int_to_ptr.hbm [resolvable:$true] %s16_s14 }
   0x3   :  { %s18_s16 = sshll.u32 %s300_s15, 4  ;;  %s26_s19 = sshll.u32 %s338_s1, 4  ;;  %s19_s16 = int_to_ptr.vmem [resolvable:$true] %s18_s16  ;;  %s27_s19 = int_to_ptr.hbm [resolvable:$true] %s26_s19 }
   0x4   :  { %21 = dma.hbm_to_vmem [thread:$0]  %s17_s14, 512, %s19_s16, [#allocation3]  }
   0x5   :  { %s301_s20 = smov [#allocation5]   ;;  %s302_s22 = smov 128  }
   0x6   :  { %s28_s21 = sshll.u32 %s301_s20, 4  ;;  %s303_s23 = smov 8   ;;  %s29_s21 = int_to_ptr.vmem [resolvable:$true] %s28_s21 }
   0x7   :  { %34 = dma.hbm_to_vmem [thread:$0]  %s27_s19, 8192, %s29_s21, [#allocation6], %s302_s22, %s302_s22, %s303_s23  }
   0x8   :  { %294 = dma.done.wait [#allocation3], 512  }
   0x9   :  { %295 = vsyncadd [#allocation3], 4294966784 }
   0xa   :  { %296 = dma.done.wait [#allocation6], 8192  }
   0xb   :  { %297 = vsyncadd [#allocation6], 4294959104  ;;  %v96_v0 = vld [vmem:[#allocation5 + $0x178] sm:$0xff]  ;;  %v95_v2 = vld [vmem:[#allocation5 + $0x170] sm:$0xff]  ;;  %s304_s24 = smov [#allocation7]   ;;  %s205_s28 = sshll.u32 %s340_s3, 4  ;;  %s206_s28 = int_to_ptr.hbm [resolvable:$true] %s205_s28 }
   0xc   :  { %v64_v1 = vld [vmem:[#allocation5 + $0x78] sm:$0xff]  ;;  %157 = vmatpush.msra.mxu2 %v96_v0  ;;  %v63_v4 = vld [vmem:[#allocation5 + $0x70] sm:$0xff]  ;;  %v94_v6 = vld [vmem:[#allocation5 + $0x168] sm:$0xff]  ;;  %s203_s25 = sshll.u32 %s304_s24, 4  ;;  %s204_s25 = int_to_ptr.vmem [resolvable:$true] %s203_s25 }
   0xd   :  { %117 = vmatpush.msra.mxu0 %v64_v1  ;;  %v112_v3 = vld [vmem:[#allocation5 + $0x1f8] sm:$0xff]  ;;  %v111_v7 = vld [vmem:[#allocation5 + $0x1f0] sm:$0xff]  ;;  %v62_v8 = vld [vmem:[#allocation5 + $0x68] sm:$0xff] }
   0xe   :  { %v80_v5 = vld [vmem:[#allocation5 + $0xf8] sm:$0xff]  ;;  %177 = vmatpush.msra.mxu3 %v112_v3  ;;  %158 = vmatpush.msra.mxu2 %v95_v2  ;;  %v79_v9 = vld [vmem:[#allocation5 + $0xf0] sm:$0xff]  ;;  %v110_v10 = vld [vmem:[#allocation5 + $0x1e8] sm:$0xff] }
   0xf   :  { %137 = vmatpush.msra.mxu1 %v80_v5  ;;  %118 = vmatpush.msra.mxu0 %v63_v4  ;;  %v93_v11 = vld [vmem:[#allocation5 + $0x160] sm:$0xff]  ;;  %v78_v13 = vld [vmem:[#allocation5 + $0xe8] sm:$0xff]  ;;  %v92_v16 = vld [vmem:[#allocation5 + $0x158] sm:$0xff] }
  0x10   :  { %178 = vmatpush.msra.mxu3 %v111_v7  ;;  %v61_v12 = vld [vmem:[#allocation5 + $0x60] sm:$0xff]  ;;  %159 = vmatpush.msra.mxu2 %v94_v6  ;;  %v60_v17 = vld [vmem:[#allocation5 + $0x58] sm:$0xff]  ;;  %v91_v20 = vld [vmem:[#allocation5 + $0x150] sm:$0xff] }
  0x11   :  { %138 = vmatpush.msra.mxu1 %v79_v9  ;;  %119 = vmatpush.msra.mxu0 %v62_v8  ;;  %v109_v14 = vld [vmem:[#allocation5 + $0x1e0] sm:$0xff]  ;;  %v108_v18 = vld [vmem:[#allocation5 + $0x1d8] sm:$0xff]  ;;  %v59_v21 = vld [vmem:[#allocation5 + $0x50] sm:$0xff] }
  0x12   :  { %v77_v15 = vld [vmem:[#allocation5 + $0xe0] sm:$0xff]  ;;  %179 = vmatpush.msra.mxu3 %v110_v10  ;;  %160 = vmatpush.msra.mxu2 %v93_v11  ;;  %v76_v19 = vld [vmem:[#allocation5 + $0xd8] sm:$0xff]  ;;  %v107_v22 = vld [vmem:[#allocation5 + $0x1d0] sm:$0xff] }
  0x13   :  { %139 = vmatpush.msra.mxu1 %v78_v13  ;;  %120 = vmatpush.msra.mxu0 %v61_v12  ;;  %v75_v23 = vld [vmem:[#allocation5 + $0xd0] sm:$0xff]  ;;  %v90_v24 = vld [vmem:[#allocation5 + $0x148] sm:$0xff]  ;;  %v89_v28 = vld [vmem:[#allocation5 + $0x140] sm:$0xff] }
  0x14   :  { %180 = vmatpush.msra.mxu3 %v109_v14  ;;  %161 = vmatpush.msra.mxu2 %v92_v16  ;;  %v58_v25 = vld [vmem:[#allocation5 + $0x48] sm:$0xff]  ;;  %v57_v29 = vld [vmem:[#allocation5 + $0x40] sm:$0xff]  ;;  %v88_v32 = vld [vmem:[#allocation5 + $0x138] sm:$0xff] }
  0x15   :  { %140 = vmatpush.msra.mxu1 %v77_v15  ;;  %121 = vmatpush.msra.mxu0 %v60_v17  ;;  %v106_v26 = vld [vmem:[#allocation5 + $0x1c8] sm:$0xff]  ;;  %v105_v30 = vld [vmem:[#allocation5 + $0x1c0] sm:$0xff]  ;;  %v56_v33 = vld [vmem:[#allocation5 + $0x38] sm:$0xff] }
  0x16   :  { %181 = vmatpush.msra.mxu3 %v108_v18  ;;  %162 = vmatpush.msra.mxu2 %v91_v20  ;;  %v74_v27 = vld [vmem:[#allocation5 + $0xc8] sm:$0xff]  ;;  %v73_v31 = vld [vmem:[#allocation5 + $0xc0] sm:$0xff]  ;;  %v104_v34 = vld [vmem:[#allocation5 + $0x1b8] sm:$0xff] }
  0x17   :  { %141 = vmatpush.msra.mxu1 %v76_v19  ;;  %122 = vmatpush.msra.mxu0 %v59_v21  ;;  %v72_v35 = vld [vmem:[#allocation5 + $0xb8] sm:$0xff]  ;;  %v87_v36 = vld [vmem:[#allocation5 + $0x130] sm:$0xff]  ;;  %v86_v40 = vld [vmem:[#allocation5 + $0x128] sm:$0xff] }
  0x18   :  { %182 = vmatpush.msra.mxu3 %v107_v22  ;;  %163 = vmatpush.msra.mxu2 %v90_v24  ;;  %v55_v37 = vld [vmem:[#allocation5 + $0x30] sm:$0xff]  ;;  %v54_v41 = vld [vmem:[#allocation5 + $0x28] sm:$0xff]  ;;  %v85_v44 = vld [vmem:[#allocation5 + $0x120] sm:$0xff] }
  0x19   :  { %142 = vmatpush.msra.mxu1 %v75_v23  ;;  %123 = vmatpush.msra.mxu0 %v58_v25  ;;  %v103_v38 = vld [vmem:[#allocation5 + $0x1b0] sm:$0xff]  ;;  %v102_v42 = vld [vmem:[#allocation5 + $0x1a8] sm:$0xff]  ;;  %v53_v45 = vld [vmem:[#allocation5 + $0x20] sm:$0xff] }
  0x1a   :  { %183 = vmatpush.msra.mxu3 %v106_v26  ;;  %164 = vmatpush.msra.mxu2 %v89_v28  ;;  %v71_v39 = vld [vmem:[#allocation5 + $0xb0] sm:$0xff]  ;;  %v70_v43 = vld [vmem:[#allocation5 + $0xa8] sm:$0xff]  ;;  %v101_v46 = vld [vmem:[#allocation5 + $0x1a0] sm:$0xff] }
  0x1b   :  { %143 = vmatpush.msra.mxu1 %v74_v27  ;;  %124 = vmatpush.msra.mxu0 %v57_v29  ;;  %v69_v47 = vld [vmem:[#allocation5 + $0xa0] sm:$0xff]  ;;  %v84_v48 = vld [vmem:[#allocation5 + $0x118] sm:$0xff]  ;;  %v83_v52 = vld [vmem:[#allocation5 + $0x110] sm:$0xff] }
  0x1c   :  { %184 = vmatpush.msra.mxu3 %v105_v30  ;;  %165 = vmatpush.msra.mxu2 %v88_v32  ;;  %v52_v49 = vld [vmem:[#allocation5 + $0x18] sm:$0xff]  ;;  %v51_v53 = vld [vmem:[#allocation5 + $0x10] sm:$0xff]  ;;  %v82_v56 = vld [vmem:[#allocation5 + $0x108] sm:$0xff] }
  0x1d   :  { %144 = vmatpush.msra.mxu1 %v73_v31  ;;  %125 = vmatpush.msra.mxu0 %v56_v33  ;;  %v100_v50 = vld [vmem:[#allocation5 + $0x198] sm:$0xff]  ;;  %v99_v54 = vld [vmem:[#allocation5 + $0x190] sm:$0xff]  ;;  %v50_v57 = vld [vmem:[#allocation5 + $0x8] sm:$0xff] }
  0x1e   :  { %185 = vmatpush.msra.mxu3 %v104_v34  ;;  %166 = vmatpush.msra.mxu2 %v87_v36  ;;  %v68_v51 = vld [vmem:[#allocation5 + $0x98] sm:$0xff]  ;;  %v67_v55 = vld [vmem:[#allocation5 + $0x90] sm:$0xff]  ;;  %v98_v58 = vld [vmem:[#allocation5 + $0x188] sm:$0xff] }
  0x1f   :  { %145 = vmatpush.msra.mxu1 %v72_v35  ;;  %126 = vmatpush.msra.mxu0 %v55_v37  ;;  %v66_v59 = vld [vmem:[#allocation5 + $0x88] sm:$0xff]  ;;  %v81_v60 = vld [vmem:[#allocation5 + $0x100] sm:$0xff]  ;;  %v47_v62 = vld [vmem:[#allocation2 + $0x10] sm:$0xff] }
  0x20   :  { %186 = vmatpush.msra.mxu3 %v103_v38  ;;  %167 = vmatpush.msra.mxu2 %v86_v40  ;;  %v49_v61 = vld [vmem:[#allocation5] sm:$0xff]  ;;  %v48_v1 = vld [vmem:[#allocation2 + $0x18] sm:$0xff]  ;;  %v46_v3 = vld [vmem:[#allocation2 + $0x8] sm:$0xff] }
  0x21   :  { %146 = vmatpush.msra.mxu1 %v71_v39  ;;  %127 = vmatpush.msra.mxu0 %v54_v41  ;;  %v97_v63 = vld [vmem:[#allocation5 + $0x180] sm:$0xff] }
  0x22   :  { %187 = vmatpush.msra.mxu3 %v102_v42  ;;  %168 = vmatpush.msra.mxu2 %v85_v44  ;;  %v45_v0 = vld [vmem:[#allocation2] sm:$0xff] }
  0x23   :  { %147 = vmatpush.msra.mxu1 %v70_v43  ;;  %128 = vmatpush.msra.mxu0 %v53_v45  ;;  %v65_v2 = vld [vmem:[#allocation5 + $0x80] sm:$0xff] }
  0x24   :  { %188 = vmatpush.msra.mxu3 %v101_v46  ;;  %169 = vmatpush.msra.mxu2 %v84_v48  ;;  %v221_v4 = vld [vmem:[%s339_s2] ss:$0 sm:$0xff] }
  0x25   :  { %148 = vmatpush.msra.mxu1 %v69_v47  ;;  %129 = vmatpush.msra.mxu0 %v52_v49 }
  0x26   :  { %189 = vmatpush.msra.mxu3 %v100_v50  ;;  %170 = vmatpush.msra.mxu2 %v83_v52 }
  0x27   :  { %149 = vmatpush.msra.mxu1 %v68_v51  ;;  %130 = vmatpush.msra.mxu0 %v51_v53 }
  0x28   :  { %190 = vmatpush.msra.mxu3 %v99_v54  ;;  %171 = vmatpush.msra.mxu2 %v82_v56 }
  0x29   :  { %150 = vmatpush.msra.mxu1 %v67_v55  ;;  %131 = vmatpush.msra.mxu0 %v50_v57 }
  0x2a   :  { %191 = vmatpush.msra.mxu3 %v98_v58  ;;  %172 = vmatpush.msra.mxu2 %v81_v60 }
  0x2b   :  { %151 = vmatpush.msra.mxu1 %v66_v59  ;;  %132 = vmatpush.msra.mxu0 %v49_v61 }
  0x2c   :  { %173 = vmatmul.f32.vlgmr.msra.gmra.mxu2 %v47_v62  ;;  %192 = vmatpush.msra.mxu3 %v97_v63 }
  0x2d   :  { %133 = vmatmul.f32.vlgmr.msra.gmra.mxu0 %v45_v0  ;;  %193 = vmatmul.f32.vlgmr.msra.gmra.mxu3 %v48_v1 }
  0x2e   :  { %152 = vmatpush.msra.mxu1 %v65_v2 }
  0x2f   :  { %153 = vmatmul.f32.vlgmr.msra.gmra.mxu1 %v46_v3 }
  0xaa   :  { %v134_v5 = vpop.f32.mrf.mxu0 }
  0xab   :  { %v135_v6 = vadd.f32 %v221_v4, %v134_v5 }
  0xac   :  { %v154_v7 = vpop.f32.mrf.mxu1 }
  0xad   :  { %v155_v8 = vadd.f32 %v154_v7, %v135_v6 }
  0xaf   :  { %v174_v9 = vpop.f32.mrf.mxu2 }
  0xb0   :  { %v175_v10 = vadd.f32 %v174_v9, %v155_v8  ;;  %v194_v11 = vpop.f32.mrf.mxu3 }
  0xb2   :  { %v195_v12 = vadd.f32 %v194_v11, %v175_v10 }
  0xb4   :  { %197 = vst [vmem:[#allocation7] sm:$0xff] %v195_v12 }
  0xb5   :  { %208 = dma.vmem_to_hbm [thread:$0]  %s204_s25, 128, %s206_s28, [#allocation4]  }
  0xb6   :  { %298 = dma.done.wait [#allocation4], 128  }
  0xb7   :  { %299 = vsyncadd [#allocation4], 4294967168 }
  0xb8   :  { %213 = vsyncpa [#allocation3], 1 }
  0xb9   :  { %214 = vsyncpa [#allocation6], 1 }
  0xba   :  { %215 = vsyncpa [#allocation4], 1 }

</bundles_post_ra>
